<compile_context>
chip_gen: v7x
topology: tpu7x:2x2x1
jax: 0.10.0
libtpu: 0.0.40
codegen_flags: <defaults>
</compile_context>

<pallas_src>
import jax
import jax.numpy as jnp
from jax.experimental import pallas as pl
from jax.experimental.pallas import tpu as pltpu


# ---------------------------------------------------------------------------
# Pallas kernel
# ---------------------------------------------------------------------------

def _sse_kernel(u_ref, w_ref, o_ref):
    """One (1, C, THW) tile: out = u * sigmoid(sum_c w[c] * u[c, :])."""
    u = u_ref[0].astype(jnp.float32)          # (C, THW)
    w = w_ref[...]                            # (C, 1) f32
    # sSE attention map: VPU multiply + sublane reduction (no 1-column matmul).
    q = jax.nn.sigmoid(jnp.sum(u * w, axis=0, keepdims=True))   # (1, THW)
    o_ref[0] = (u * q).astype(o_ref.dtype)


def _pick_spatial_tile(hw, c, itemsize):
    """Largest lane-dense spatial tile that keeps blocks comfortably in VMEM."""
    if hw % 128 != 0:
        # BlockSpec requires the last block dim to be a multiple of 128 or the
        # full extent; small / odd spatial sizes just take the full extent.
        return hw
    budget = 2 * 1024 * 1024                  # bytes per (C, THW) block
    t = max(128, (budget // max(1, c * itemsize)) // 128 * 128)
    return min(hw, t)


def sse_forward(U, w):
    """sSE forward.

    U: (N, C, H, W) activation (f32 or bf16).
    w: (C,) weight of the Conv2d(C, 1, kernel_size=1, bias=False)
       (i.e. the PyTorch weight of shape (1, C, 1, 1) flattened).
    Returns U * sigmoid(conv1x1(U)), same shape/dtype as U.
    """
    N, C, H, W = U.shape
    HW = H * W
    u = U.reshape(N, C, HW)                   # free reshape, no data movement
    w2 = w.reshape(C, 1).astype(jnp.float32)

    thw = _pick_spatial_tile(HW, C, jnp.dtype(U.dtype).itemsize)
    grid = (N, pl.cdiv(HW, thw))              # ragged last tile masked by Pallas

    out = pl.pallas_call(
        _sse_kernel,
        out_shape=jax.ShapeDtypeStruct((N, C, HW), U.dtype),
        grid=grid,
        in_specs=[
            pl.BlockSpec((1, C, thw), lambda n, j: (n, 0, j)),
            pl.BlockSpec((C, 1), lambda n, j: (0, 0)),
        ],
        out_specs=pl.BlockSpec((1, C, thw), lambda n, j: (n, 0, j)),
        compiler_params=pltpu.CompilerParams(
            dimension_semantics=("parallel", "parallel")),
    )(u, w2)
    return out.reshape(N, C, H, W)


# ---------------------------------------------------------------------------
# Reference (pure jnp) for correctness checking
# ---------------------------------------------------------------------------

def sse_reference(U, w):
    q = jax.nn.sigmoid(jnp.einsum('nchw,c->nhw', U.astype(jnp.float32),
                                  w.astype(jnp.float32)))[:, None, :, :]
    return (U.astype(jnp.float32) * q).astype(U.dtype)


# ---------------------------------------------------------------------------
# Demo
# ---------------------------------------------------------------------------

if __name__ == "__main__":
    key = jax.random.PRNGKey(0)
    ku, kw = jax.random.split(key)

    # Small shapes consistent with the module: batch=2, channels=4, spatial=16.
    N, C, H, W = 2, 4, 16, 16
    U = jax.random.normal(ku, (N, C, H, W), jnp.float32)
    # Conv2d(C, 1, 1, bias=False) weight, flattened from (1, C, 1, 1) -> (C,).
    w = 0.1 * jax.random.normal(kw, (C,), jnp.float32)

    fwd = jax.jit(sse_forward)
    out = jax.block_until_ready(fwd(U, w))

    assert out.shape == (N, C, H, W), out.shape
    assert bool(jnp.all(jnp.isfinite(out)))

    ref = sse_reference(U, w)
    assert bool(jnp.allclose(out, ref, atol=1e-5, rtol=1e-5)), (
        float(jnp.max(jnp.abs(out - ref))))

    print("KERNEL_OK")
</pallas_src>

<mosaic_0001>
module attributes {stable_mosaic.version = 11 : i64} {
  func.func @_sse_kernel(%arg0: i32, %arg1: i32, %arg2: memref<1x4x256xf32, #tpu.memory_space<vmem>>, %arg3: memref<4x1xf32, #tpu.memory_space<vmem>>, %arg4: memref<1x4x256xf32, #tpu.memory_space<vmem>>) attributes {dimension_semantics = [#tpu.dimension_semantics<parallel>, #tpu.dimension_semantics<parallel>], iteration_bounds = array<i64: 2, 1>, scalar_prefetch = 0 : i64, scratch_operands = 0 : i64, tpu.core_type = #tpu.core_type<tc>, window_params = [{transform_indices = @transform_0, window_bounds = array<i64: 1, 4, 256>}, {pipeline_mode = #tpu.pipeline_mode<synchronous>, transform_indices = @transform_1, window_bounds = array<i64: 4, 1>}, {transform_indices = @transform_2, window_bounds = array<i64: 1, 4, 256>}]} {
    %c0 = arith.constant 0 : index
    %c0_0 = arith.constant 0 : index
    %c0_1 = arith.constant 0 : index
    %0 = vector.load %arg2[%c0, %c0_0, %c0_1] : memref<1x4x256xf32, #tpu.memory_space<vmem>>, vector<1x4x256xf32>
    %1 = vector.shape_cast %0 : vector<1x4x256xf32> to vector<4x256xf32>
    %c0_2 = arith.constant 0 : index
    %c0_3 = arith.constant 0 : index
    %2 = vector.load %arg3[%c0_2, %c0_3] : memref<4x1xf32, #tpu.memory_space<vmem>>, vector<4x1xf32>
    %3 = vector.broadcast %2 : vector<4x1xf32> to vector<4x256xf32>
    %4 = arith.mulf %1, %3 : vector<4x256xf32>
    %cst = arith.constant dense<0.000000e+00> : vector<256xf32>
    %5 = vector.multi_reduction <add>, %4, %cst [0] : vector<4x256xf32> to vector<256xf32>
    %6 = vector.shape_cast %5 : vector<256xf32> to vector<1x256xf32>
    %7 = arith.negf %6 : vector<1x256xf32>
    %8 = math.exp %7 : vector<1x256xf32>
    %cst_4 = arith.constant 1.000000e+00 : f32
    %9 = vector.broadcast %cst_4 : f32 to vector<1x256xf32>
    %10 = arith.addf %9, %8 : vector<1x256xf32>
    %11 = arith.divf %9, %10 : vector<1x256xf32>
    %12 = vector.broadcast %11 : vector<1x256xf32> to vector<4x256xf32>
    %13 = arith.mulf %1, %12 : vector<4x256xf32>
    %c0_5 = arith.constant 0 : index
    %c0_6 = arith.constant 0 : index
    %c0_7 = arith.constant 0 : index
    %14 = vector.load %arg4[%c0_5, %c0_6, %c0_7] : memref<1x4x256xf32, #tpu.memory_space<vmem>>, vector<1x4x256xf32>
    %15 = vector.shape_cast %14 : vector<1x4x256xf32> to vector<4x256xf32>
    %16 = vector.shape_cast %13 : vector<4x256xf32> to vector<1x4x256xf32>
    tpu.vector_store %arg4[%c0_5, %c0_6, %c0_7], %16 {strides = array<i32>} : memref<1x4x256xf32, #tpu.memory_space<vmem>>, vector<1x4x256xf32>,
    return
  }
  func.func @transform_0(%arg0: i32, %arg1: i32) -> (i32, i32, i32) {
    %c0_i32 = arith.constant 0 : i32
    %c0_i32_0 = arith.constant 0 : i32
    return %arg0, %c0_i32, %arg1 : i32, i32, i32
  }
  func.func @transform_1(%arg0: i32, %arg1: i32) -> (i32, i32) {
    %c0_i32 = arith.constant 0 : i32
    %c0_i32_0 = arith.constant 0 : i32
    %c0_i32_1 = arith.constant 0 : i32
    return %c0_i32, %c0_i32_0 : i32, i32
  }
  func.func @transform_2(%arg0: i32, %arg1: i32) -> (i32, i32, i32) {
    %c0_i32 = arith.constant 0 : i32
    %c0_i32_0 = arith.constant 0 : i32
    return %arg0, %c0_i32, %arg1 : i32, i32, i32
  }
}

</mosaic_0001>

<bundles_post_ra>
// kernel: sse_forward.1
= control target key start
LH: loop header
LB: loop body
LE: loop exit
PB: predicated region body
PF: predicated region fallthrough
CT: control target
= control target key end

     0   :  { %s412_s9 = smov 0   ;;  %s414_s10 = smov 0   ;;  %s455_s0 = inlined_call_operand.vmem [shape: f32[2,4,256], index: 0, kind: input, shape index: {}]   ;;  %s456_s1 = inlined_call_operand.vmem [shape: f32[4,1], index: 1, kind: input, shape index: {}]   ;;  %s457_s2 = inlined_call_operand.vmem [shape: f32[2,4,256], index: 2, kind: output, shape index: {}]  }
   0x1   :  { %s416_s11 = smov 0  }
   0x2 LB: > { %s24_s12 = sadd.s32 1, %s389_s10  ;;  %p325_p0 = scmp.ge.s32.totalorder %s393_s11, 1  ;;  %s393_s11 = sphi %s416_s11, %s12_s11   ;;  %s389_s10 = sphi %s414_s10, %s459_s10   ;;  %s385_s9 = sphi %s412_s9, %s458_s9  }
   0x3   : > { %p26_p1 = scmp.ge.s32.totalorder %s24_s12, 2  ;;  %p133_p2 = scmp.lt.s32.totalorder %s393_s11, 3 }
   0x5   : > { %s461_s12 = smov (%p26_p1, %s24_s12), 0  ;;  %p134_p3 = pnand %p325_p0, %p133_p2 }
   0x6   : > { %v184_v0 = vld [vmem:[%s456_s1] sm:$0xf] (!%p134_p3)  ;;  %v395_v1 = vmov (!%p134_p3), 0   ;;  %p164_p4 = scmp.lt.s32.totalorder (!%p134_p3), %s385_s9, 1  ;;  %v396_v2 = vmov (!%p134_p3), 839922192   ;;  %v192_v4 = vlaneseq (!%p134_p3) }
   0x7   : > { %137 = sbr.rel (%p134_p3) target bundleno = 186 (0xba), region = 28  ;;  %362 = vset.pattern.permute.xlu0 (!%p134_p3), %v395_v1  ;;  %v190_v3 = vunpack.c.l.s4 (!%p134_p3), %v396_v2  ;;  %vm201_vm0 = vcmask (!%p134_p3), 1043456  }
   0x8   : > { %187 = vperm.xlu0 (!%p134_p3), %362, %v184_v0   ;;  %v193_v6 = vshrl.u32 (!%p134_p3), %v192_v4, 7 }
   0x9   : > { %v191_v5 = vunpack.c.0.s8 (!%p134_p3), %v190_v3 }
   0xb   : > { %v194_v7 = vsub.s32 (!%p134_p3), %v191_v5, %v193_v6 }
   0xe   : > { %s463_s9 = smov (!%p164_p4, %s385_s9), 1 }
   0xf   : > { %s334_s15 = sshll.u32 %s463_s9, 3 }
  0x10   : > { %s171_s18 = scalar_lea.vmem %s455_s0, %s334_s15  ;;  %s181_s21 = scalar_lea.vmem %s457_s2, %s334_s15 }
  0x11   : > { %v183_v9 = vld [vmem:[%s171_s18] sm:$0xff] }
  0x87   : > { %v188_v8 = vpop.permute.xlu0 %187 }
  0x88   : > { %v195_v10 = vrot.slane %v188_v8, %v194_v7 }
  0x8a   : > { %v197_v11 = vmul.f32 %v195_v10, %v183_v9 }
  0x8c   : > { %v199_v12 = vcombine.high %v197_v11, %v197_v11  ;;  %v202_v13 = vsel %vm201_vm0, %v197_v11, 0.0 }
  0x8d   : > { %v203_v14 = vrot.slane %v202_v13, 4 }
  0x8e   : > { %v209_v15 = vsel %vm201_vm0, %v199_v12, 0.0 }
  0x8f   : > { %v204_v16 = vadd.f32 %v203_v14, %v202_v13  ;;  %v210_v17 = vrot.slane %v209_v15, 4 }
  0x91   : > { %v205_v18 = vrot.slane %v204_v16, 2  ;;  %v211_v19 = vadd.f32 %v210_v17, %v209_v15 }
  0x93   : > { %v206_v20 = vadd.f32 %v205_v18, %v204_v16  ;;  %v212_v21 = vrot.slane %v211_v19, 2 }
  0x95   : > { %v207_v22 = vrot.slane %v206_v20, 1  ;;  %v213_v23 = vadd.f32 %v212_v21, %v211_v19 }
  0x97   : > { %v208_v24 = vadd.f32 %v207_v22, %v206_v20  ;;  %v214_v25 = vrot.slane %v213_v23, 1 }
  0x99   : > { %v215_v26 = vadd.f32 %v214_v25, %v213_v23  ;;  %v330_v27 = vmul.f32 -1.442695, %v208_v24 }
  0x9b   : > { %363 = vpow2.f32 %v330_v27  ;;  %v331_v28 = vmul.f32 -1.442695, %v215_v26 }
  0x9d   : > { %365 = vpow2.f32 %v331_v28 }
  0xa5   : > { %v364_v29 = vpop.eup %363 }
  0xa6   : > { %v222_v30 = vadd.f32 1.0, %v364_v29 }
  0xa7   : > { %v366_v31 = vpop.eup %365 }
  0xa8   : > { %v223_v32 = vadd.f32 1.0, %v366_v31  ;;  %367 = vrcp.f32 %v222_v30 }
  0xaa   : > { %369 = vrcp.f32 %v223_v32 }
  0xb2   : > { %v368_v33 = vpop.eup %367 }
  0xb4   : > { %v370_v34 = vpop.eup %369 }
  0xb5   : > { %v230_v35 = vcombine.low %v368_v33, %v370_v34 }
  0xb7   : > { %v232_v36 = vmul.f32 %v230_v35, %v183_v9 }
  0xb9   : > { %233 = vst [vmem:[%s181_s21] sm:$0xff] %v232_v36 }
  0xba PF: > { %s12_s11 = sadd.s32 1, %s393_s11   ;;  %s458_s9 = smov %s389_s10 }
  0xbb   : > { %p9_p5 = scmp.ge.s32.totalorder %s12_s11, 4   ;;  %s459_s10 = smov %s461_s12 }
  0xbd   :  { %11 = sbr.rel (!%p9_p5) target bundleno = 2 (0x2), region = 58 }

</bundles_post_ra>
